<compile_context>
chip_gen: v7x
topology: tpu7x:2x2x1
jax: 0.10.0
libtpu: 0.0.40
codegen_flags: <defaults>
</compile_context>

<pallas_src>
import jax
import jax.numpy as jnp
from jax.experimental import pallas as pl
from jax.experimental.pallas import tpu as pltpu

_LANE = 128           # lane width of a vreg
_ROW_QUANTUM = 16     # sublane quantum safe for both f32 and bf16 blocks
_MAX_ROWS_PER_STEP = 64
_MAX_B_TILE = 8


def _round_up(x: int, m: int) -> int:
    return ((x + m - 1) // m) * m


def _wsp_partial_kernel(x_ref, z_ref, out_ref):
    """Accumulates per-sample partial sums for the presence loss.

    x_ref  : (B_TILE, ROWS, 128) logits block (native dtype, cast to f32 here).
    z_ref  : (B_TILE, ROWS, 128) presence block (bf16; {0,1} real, -1 padding).
    out_ref: (4, B_TILE, 128) f32, resident across the N ("arbitrary") axis:
               [0] sum of BCE over presence==0 cells
               [1] count of presence==0 cells
               [2] sum of sigmoid(logits) over presence==1 cells
               [3] count of presence==1 cells
    """
    n = pl.program_id(1)

    @pl.when(n == 0)
    def _():
        out_ref[...] = jnp.zeros_like(out_ref)

    x = x_ref[...].astype(jnp.float32)
    z = z_ref[...].astype(jnp.float32)

    neg = (z == 0.0).astype(jnp.float32)
    pos = (z == 1.0).astype(jnp.float32)

    # e = exp(-|x|) is shared by the stable BCE-with-logits and the sigmoid.
    e = jnp.exp(-jnp.abs(x))
    inv = 1.0 / (1.0 + e)                       # exact reciprocal (keeps 1e-5 tol)
    p = jnp.where(x >= 0.0, inv, e * inv)       # sigmoid(x)
    bce = jnp.maximum(x, 0.0) - x * z + jnp.log1p(e)

    # Reduce only the row (sublane) axis here; the lane axis is reduced in the
    # tiny JAX epilogue, so every store is a full, lane-dense (B_TILE, 128) tile.
    out_ref[0] += jnp.sum(bce * neg, axis=1)
    out_ref[1] += jnp.sum(neg, axis=1)
    out_ref[2] += jnp.sum(p * pos, axis=1)
    out_ref[3] += jnp.sum(pos, axis=1)


def weakly_supervised_presence_loss(
        visual_grounding_confidence_logits,
        visual_grounding_confidence_probs,
        target_presence,
        target_area_ratio,
        area_loss_weight: float = 1.0,
        *,
        rows_per_step: int | None = None,
        b_tile: int | None = None):
    """Scalar f32 loss matching WeaklySupervisedPresenceLoss.forward().

    `visual_grounding_confidence_probs` is accepted for API parity but not
    streamed to the kernel: the module defines it as sigmoid(logits), which the
    kernel recomputes on-chip (saves one full (B, N) HBM read).
    """
    del visual_grounding_confidence_probs     # recomputed in-kernel from logits
    logits = visual_grounding_confidence_logits
    B, N = logits.shape

    # ---- tiling -------------------------------------------------------------
    rows = -(-N // _LANE)                                   # lanes -> sublanes
    if rows_per_step is None:
        rows_per_step = min(_MAX_ROWS_PER_STEP, _round_up(rows, _ROW_QUANTUM))
    rows_per_step = _round_up(rows_per_step, _ROW_QUANTUM)
    rows_pad = _round_up(rows, rows_per_step)
    n_pad = rows_pad * _LANE
    if b_tile is None:
        b_tile = min(B, _MAX_B_TILE)
    b_pad = _round_up(B, b_tile)

    # ---- pad + fold N into (rows, 128) --------------------------------------
    # Logits pad with 0 (finite math; masked out anyway).  Presence is sent as
    # bf16 ({0,1} and -1 are exact in bf16) and padded with -1 so padded cells
    # match neither mask.
    x = jnp.pad(logits, ((0, b_pad - B), (0, n_pad - N)))
    z = jnp.pad(target_presence.astype(jnp.bfloat16),
                ((0, b_pad - B), (0, n_pad - N)), constant_values=-1.0)
    x3 = x.reshape(b_pad, rows_pad, _LANE)
    z3 = z.reshape(b_pad, rows_pad, _LANE)

    grid = (b_pad // b_tile, rows_pad // rows_per_step)
    in_block = (b_tile, rows_per_step, _LANE)

    partials = pl.pallas_call(
        _wsp_partial_kernel,
        out_shape=jax.ShapeDtypeStruct((4, b_pad, _LANE), jnp.float32),
        grid=grid,
        in_specs=[
            pl.BlockSpec(in_block, lambda b, n: (b, n, 0)),
            pl.BlockSpec(in_block, lambda b, n: (b, n, 0)),
        ],
        out_specs=pl.BlockSpec((4, b_tile, _LANE), lambda b, n: (0, b, 0)),
        compiler_params=pltpu.CompilerParams(
            dimension_semantics=("parallel", "arbitrary"),
            vmem_limit_bytes=32 * 1024 * 1024),
    )(x3, z3)

    # ---- tiny O(B) epilogue (final divisions / means) -----------------------
    sums = jnp.sum(partials, axis=-1)[:, :B]                # (4, B)
    neg_loss_sum, num_neg, pred_area, true_area = sums

    bce_per_sample = neg_loss_sum / jnp.maximum(num_neg, 1.0)
    bce_component = jnp.mean(bce_per_sample)

    ratio = target_area_ratio.astype(jnp.float32).reshape(B)
    valid = true_area > 0.0
    pred_avg_prob = pred_area / jnp.maximum(true_area, 1.0)
    sq_err = jnp.where(valid, (pred_avg_prob - ratio) ** 2, 0.0)
    n_valid = jnp.sum(valid.astype(jnp.float32))
    area_component = jnp.where(
        n_valid > 0.0, jnp.sum(sq_err) / jnp.maximum(n_valid, 1.0), 0.0)

    return bce_component + jnp.float32(area_loss_weight) * area_component


def _reference_loss(logits, probs, tp, ratio, area_loss_weight=1.0):
    """Pure-JAX reference mirroring the PyTorch module exactly."""
    logits = logits.astype(jnp.float32)
    probs = probs.astype(jnp.float32)
    tp = tp.astype(jnp.float32)
    bce = (jnp.maximum(logits, 0.0) - logits * tp
           + jnp.log1p(jnp.exp(-jnp.abs(logits))))
    neg_mask = (tp == 0).astype(jnp.float32)
    bce_per_sample = (bce * neg_mask).sum(1) / jnp.maximum(neg_mask.sum(1), 1.0)
    bce_comp = bce_per_sample.mean()
    pos_mask = (tp == 1).astype(jnp.float32)
    pred_area = (probs * pos_mask).sum(1)
    true_area = pos_mask.sum(1)
    valid = true_area > 0
    pred_avg = pred_area / jnp.maximum(true_area, 1.0)
    sq = ((pred_avg - ratio) ** 2) * valid
    n_valid = valid.sum()
    area = jnp.where(n_valid > 0, sq.sum() / jnp.maximum(n_valid, 1), 0.0)
    return bce_comp + area_loss_weight * area


if __name__ == "__main__":
    key = jax.random.PRNGKey(0)
    B, H, W = 2, 50, 50          # N = 2500: exercises lane padding + sentinel
    N = H * W

    k1, k2, k3 = jax.random.split(key, 3)
    # bf16 logits: transported without upcasting, cast to f32 only on-chip.
    logits = (jax.random.normal(k1, (B, N), dtype=jnp.float32) * 2.0
              ).astype(jnp.bfloat16)
    probs = jax.nn.sigmoid(logits.astype(jnp.float32))   # module input (unused by kernel)
    target_presence = (jax.random.uniform(k2, (B, N)) > 0.7).astype(jnp.float32)
    target_area_ratio = jax.random.uniform(k3, (B,), dtype=jnp.float32)

    # rows_per_step=16 forces a multi-step grid along N even at this small size,
    # exercising the resident-output accumulation path.
    loss = weakly_supervised_presence_loss(
        logits, probs, target_presence, target_area_ratio,
        area_loss_weight=1.0, rows_per_step=16)
    loss = jax.block_until_ready(loss)

    ref = _reference_loss(logits, probs, target_presence, target_area_ratio, 1.0)
    assert jnp.allclose(loss, ref, atol=1e-5, rtol=1e-5), (loss, ref)

    print("KERNEL_OK")
</pallas_src>

<mosaic_0001>
module attributes {stable_mosaic.version = 11 : i64} {
  func.func @_wsp_partial_kernel(%arg0: i32, %arg1: i32, %arg2: memref<2x16x128xbf16, #tpu.memory_space<vmem>>, %arg3: memref<2x16x128xbf16, #tpu.memory_space<vmem>>, %arg4: memref<4x2x128xf32, #tpu.memory_space<vmem>>) attributes {dimension_semantics = [#tpu.dimension_semantics<parallel>, #tpu.dimension_semantics<arbitrary>], iteration_bounds = array<i64: 1, 2>, scalar_prefetch = 0 : i64, scratch_operands = 0 : i64, tpu.core_type = #tpu.core_type<tc>, window_params = [{transform_indices = @transform_0, window_bounds = array<i64: 2, 16, 128>}, {transform_indices = @transform_1, window_bounds = array<i64: 2, 16, 128>}, {transform_indices = @transform_2, window_bounds = array<i64: 4, 2, 128>}]} {
    %c0_i32 = arith.constant 0 : i32
    %0 = arith.cmpi eq, %arg1, %c0_i32 : i32
    %1 = arith.extui %0 : i1 to i32
    %c0_i32_0 = arith.constant 0 : i32
    %2 = arith.cmpi ne, %1, %c0_i32_0 : i32
    scf.if %2 {
      %cst_37 = arith.constant 0.000000e+00 : f32
      %63 = vector.broadcast %cst_37 : f32 to vector<4x2x128xf32>
      %c0_38 = arith.constant 0 : index
      %c0_39 = arith.constant 0 : index
      %c0_40 = arith.constant 0 : index
      %64 = vector.load %arg4[%c0_38, %c0_39, %c0_40] : memref<4x2x128xf32, #tpu.memory_space<vmem>>, vector<4x2x128xf32>
      tpu.vector_store %arg4[%c0_38, %c0_39, %c0_40], %63 {strides = array<i32>} : memref<4x2x128xf32, #tpu.memory_space<vmem>>, vector<4x2x128xf32>,
    } else {
    }
    %c0 = arith.constant 0 : index
    %c0_1 = arith.constant 0 : index
    %c0_2 = arith.constant 0 : index
    %3 = vector.load %arg2[%c0, %c0_1, %c0_2] : memref<2x16x128xbf16, #tpu.memory_space<vmem>>, vector<2x16x128xbf16>
    %4 = arith.extf %3 : vector<2x16x128xbf16> to vector<2x16x128xf32>
    %c0_3 = arith.constant 0 : index
    %c0_4 = arith.constant 0 : index
    %c0_5 = arith.constant 0 : index
    %5 = vector.load %arg3[%c0_3, %c0_4, %c0_5] : memref<2x16x128xbf16, #tpu.memory_space<vmem>>, vector<2x16x128xbf16>
    %6 = arith.extf %5 : vector<2x16x128xbf16> to vector<2x16x128xf32>
    %cst = arith.constant 0.000000e+00 : f32
    %7 = vector.broadcast %cst : f32 to vector<2x16x128xf32>
    %8 = arith.cmpf oeq, %6, %7 : vector<2x16x128xf32>
    %9 = arith.extui %8 : vector<2x16x128xi1> to vector<2x16x128xi32>
    %10 = arith.sitofp %9 : vector<2x16x128xi32> to vector<2x16x128xf32>
    %cst_6 = arith.constant 1.000000e+00 : f32
    %11 = vector.broadcast %cst_6 : f32 to vector<2x16x128xf32>
    %12 = arith.cmpf oeq, %6, %11 : vector<2x16x128xf32>
    %13 = arith.extui %12 : vector<2x16x128xi1> to vector<2x16x128xi32>
    %14 = arith.sitofp %13 : vector<2x16x128xi32> to vector<2x16x128xf32>
    %15 = math.absf %4 : vector<2x16x128xf32>
    %cst_7 = arith.constant 0.000000e+00 : f32
    %16 = vector.broadcast %cst_7 : f32 to vector<2x16x128xf32>
    %17 = arith.subf %16, %15 : vector<2x16x128xf32>
    %18 = math.exp %17 : vector<2x16x128xf32>
    %cst_8 = arith.constant 1.000000e+00 : f32
    %19 = vector.broadcast %cst_8 : f32 to vector<2x16x128xf32>
    %20 = arith.addf %19, %18 : vector<2x16x128xf32>
    %cst_9 = arith.constant 1.000000e+00 : f32
    %21 = vector.broadcast %cst_9 : f32 to vector<2x16x128xf32>
    %22 = arith.divf %21, %20 : vector<2x16x128xf32>
    %cst_10 = arith.constant 0.000000e+00 : f32
    %23 = vector.broadcast %cst_10 : f32 to vector<2x16x128xf32>
    %24 = arith.cmpf oge, %4, %23 : vector<2x16x128xf32>
    %25 = arith.mulf %18, %22 : vector<2x16x128xf32>
    %26 = arith.select %24, %22, %25 : vector<2x16x128xi1>, vector<2x16x128xf32>
    %cst_11 = arith.constant 0.000000e+00 : f32
    %27 = vector.broadcast %cst_11 : f32 to vector<2x16x128xf32>
    %28 = arith.maximumf %4, %27 : vector<2x16x128xf32>
    %29 = arith.mulf %4, %6 : vector<2x16x128xf32>
    %30 = arith.subf %28, %29 : vector<2x16x128xf32>
    %31 = math.log1p %18 : vector<2x16x128xf32>
    %32 = arith.addf %30, %31 : vector<2x16x128xf32>
    %c0_12 = arith.constant 0 : index
    %c0_13 = arith.constant 0 : index
    %c0_14 = arith.constant 0 : index
    %33 = vector.load %arg4[%c0_12, %c0_13, %c0_14] : memref<4x2x128xf32, #tpu.memory_space<vmem>>, vector<1x2x128xf32>
    %34 = vector.shape_cast %33 : vector<1x2x128xf32> to vector<2x128xf32>
    %35 = arith.mulf %32, %10 : vector<2x16x128xf32>
    %cst_15 = arith.constant dense<0.000000e+00> : vector<2x128xf32>
    %36 = vector.multi_reduction <add>, %35, %cst_15 [1] : vector<2x16x128xf32> to vector<2x128xf32>
    %37 = arith.addf %34, %36 : vector<2x128xf32>
    %c0_16 = arith.constant 0 : index
    %c0_17 = arith.constant 0 : index
    %c0_18 = arith.constant 0 : index
    %38 = vector.load %arg4[%c0_16, %c0_17, %c0_18] : memref<4x2x128xf32, #tpu.memory_space<vmem>>, vector<1x2x128xf32>
    %39 = vector.shape_cast %38 : vector<1x2x128xf32> to vector<2x128xf32>
    %40 = vector.shape_cast %37 : vector<2x128xf32> to vector<1x2x128xf32>
    tpu.vector_store %arg4[%c0_16, %c0_17, %c0_18], %40 {strides = array<i32>} : memref<4x2x128xf32, #tpu.memory_space<vmem>>, vector<1x2x128xf32>,
    %c1 = arith.constant 1 : index
    %c0_19 = arith.constant 0 : index
    %c0_20 = arith.constant 0 : index
    %41 = vector.load %arg4[%c1, %c0_19, %c0_20] : memref<4x2x128xf32, #tpu.memory_space<vmem>>, vector<1x2x128xf32>
    %42 = vector.shape_cast %41 : vector<1x2x128xf32> to vector<2x128xf32>
    %cst_21 = arith.constant dense<0.000000e+00> : vector<2x128xf32>
    %43 = vector.multi_reduction <add>, %10, %cst_21 [1] : vector<2x16x128xf32> to vector<2x128xf32>
    %44 = arith.addf %42, %43 : vector<2x128xf32>
    %c1_22 = arith.constant 1 : index
    %c0_23 = arith.constant 0 : index
    %c0_24 = arith.constant 0 : index
    %45 = vector.load %arg4[%c1_22, %c0_23, %c0_24] : memref<4x2x128xf32, #tpu.memory_space<vmem>>, vector<1x2x128xf32>
    %46 = vector.shape_cast %45 : vector<1x2x128xf32> to vector<2x128xf32>
    %47 = vector.shape_cast %44 : vector<2x128xf32> to vector<1x2x128xf32>
    tpu.vector_store %arg4[%c1_22, %c0_23, %c0_24], %47 {strides = array<i32>} : memref<4x2x128xf32, #tpu.memory_space<vmem>>, vector<1x2x128xf32>,
    %c2 = arith.constant 2 : index
    %c0_25 = arith.constant 0 : index
    %c0_26 = arith.constant 0 : index
    %48 = vector.load %arg4[%c2, %c0_25, %c0_26] : memref<4x2x128xf32, #tpu.memory_space<vmem>>, vector<1x2x128xf32>
    %49 = vector.shape_cast %48 : vector<1x2x128xf32> to vector<2x128xf32>
    %50 = arith.mulf %26, %14 : vector<2x16x128xf32>
    %cst_27 = arith.constant dense<0.000000e+00> : vector<2x128xf32>
    %51 = vector.multi_reduction <add>, %50, %cst_27 [1] : vector<2x16x128xf32> to vector<2x128xf32>
    %52 = arith.addf %49, %51 : vector<2x128xf32>
    %c2_28 = arith.constant 2 : index
    %c0_29 = arith.constant 0 : index
    %c0_30 = arith.constant 0 : index
    %53 = vector.load %arg4[%c2_28, %c0_29, %c0_30] : memref<4x2x128xf32, #tpu.memory_space<vmem>>, vector<1x2x128xf32>
    %54 = vector.shape_cast %53 : vector<1x2x128xf32> to vector<2x128xf32>
    %55 = vector.shape_cast %52 : vector<2x128xf32> to vector<1x2x128xf32>
    tpu.vector_store %arg4[%c2_28, %c0_29, %c0_30], %55 {strides = array<i32>} : memref<4x2x128xf32, #tpu.memory_space<vmem>>, vector<1x2x128xf32>,
    %c3 = arith.constant 3 : index
    %c0_31 = arith.constant 0 : index
    %c0_32 = arith.constant 0 : index
    %56 = vector.load %arg4[%c3, %c0_31, %c0_32] : memref<4x2x128xf32, #tpu.memory_space<vmem>>, vector<1x2x128xf32>
    %57 = vector.shape_cast %56 : vector<1x2x128xf32> to vector<2x128xf32>
    %cst_33 = arith.constant dense<0.000000e+00> : vector<2x128xf32>
    %58 = vector.multi_reduction <add>, %14, %cst_33 [1] : vector<2x16x128xf32> to vector<2x128xf32>
    %59 = arith.addf %57, %58 : vector<2x128xf32>
    %c3_34 = arith.constant 3 : index
    %c0_35 = arith.constant 0 : index
    %c0_36 = arith.constant 0 : index
    %60 = vector.load %arg4[%c3_34, %c0_35, %c0_36] : memref<4x2x128xf32, #tpu.memory_space<vmem>>, vector<1x2x128xf32>
    %61 = vector.shape_cast %60 : vector<1x2x128xf32> to vector<2x128xf32>
    %62 = vector.shape_cast %59 : vector<2x128xf32> to vector<1x2x128xf32>
    tpu.vector_store %arg4[%c3_34, %c0_35, %c0_36], %62 {strides = array<i32>} : memref<4x2x128xf32, #tpu.memory_space<vmem>>, vector<1x2x128xf32>,
    return
  }
  func.func @transform_0(%arg0: i32, %arg1: i32) -> (i32, i32, i32) {
    %c0_i32 = arith.constant 0 : i32
    %c0_i32_0 = arith.constant 0 : i32
    return %arg0, %arg1, %c0_i32 : i32, i32, i32
  }
  func.func @transform_1(%arg0: i32, %arg1: i32) -> (i32, i32, i32) {
    %c0_i32 = arith.constant 0 : i32
    %c0_i32_0 = arith.constant 0 : i32
    return %arg0, %arg1, %c0_i32 : i32, i32, i32
  }
  func.func @transform_2(%arg0: i32, %arg1: i32) -> (i32, i32, i32) {
    %c0_i32 = arith.constant 0 : i32
    %c0_i32_0 = arith.constant 0 : i32
    %c0_i32_1 = arith.constant 0 : i32
    return %c0_i32, %arg0, %c0_i32_0 : i32, i32, i32
  }
}

</mosaic_0001>

<bundles_post_ra>
// kernel: tpu_custom_call.1
= control target key start
LH: loop header
LB: loop body
LE: loop exit
PB: predicated region body
PF: predicated region fallthrough
CT: control target
= control target key end

     0   :  { %7 = vsyncpa [#allocation3], 0  ;;  %s1176_s0 = inlined_call_operand.hbm [shape: bf16[2,32,128], index: 0, kind: input, shape index: {}]   ;;  %s1177_s1 = inlined_call_operand.hbm [shape: bf16[2,32,128], index: 1, kind: input, shape index: {}]   ;;  %s1178_s2 = inlined_call_operand.hbm [shape: f32[4,2,128], index: 2, kind: output, shape index: {}]  }
   0x1   :  { %9 = vsyncpa [#allocation3 + $0x1], 0 }
   0x2   :  { %10 = vsyncpa [#allocation6], 0 }
   0x3   :  { %12 = vsyncpa [#allocation6 + $0x1], 0 }
   0x4   :  { %13 = vsyncpa [#allocation4], 0  ;;  %s888_s9 = smov 0   ;;  %s890_s10 = smov 0  }
   0x5   :  { %s892_s11 = smov 0   ;;  %s894_s12 = smov 0  }
   0x6   :  { %s896_s13 = smov 0   ;;  %s898_s14 = smov 0  }
   0x7 LB: > { %s608_s15 = sadd.s32 4294967295, %s854_s14   ;;  %s28_s16 = sadd.s32 1, %s850_s13  ;;  %s854_s14 = sphi %s898_s14, %s19_s14   ;;  %s850_s13 = sphi %s896_s13, %s1194_s13   ;;  %s846_s12 = sphi %s894_s12, %s1193_s12   ;;  %s842_s11 = sphi %s892_s11, %s1192_s11   ;;  %s838_s10 = sphi %s890_s10, %s1191_s10   ;;  %s834_s9 = sphi %s888_s9, %s1190_s9  }
   0x8   : > { %p29_p0 = scmp.ge.s32.totalorder %s28_s16, 2  ;;  %s40_s17 = sadd.s32 1, %s842_s11 }
   0x9   : > { %p47_p1 = scmp.ne.s32.totalorder %s842_s11, %s838_s10  ;;  %p48_p2 = scmp.eq.s32.totalorder %s854_s14, 0 }
   0xa   : > { %s1196_s16 = smov (%p29_p0, %s28_s16), 0  ;;  %p53_p4 = scmp.ne.s32.totalorder %s838_s10, %s834_s9 }
   0xb   : > { %p924_p3 = por %p48_p2, %p47_p1  ;;  %s36_s19 = ssub.s32 %s850_s13, %s1196_s16 }
   0xc   : > { %p54_p5 = scmp.eq.s32.totalorder %s608_s15, 0  ;;  %p38_p6 = scmp.eq.s32.totalorder %s36_s19, 0 }
   0xd   : > { %p610_p8 = scmp.ge.s32.totalorder %s854_s14, 2 }
   0xe   : > { %p933_p7 = por %p54_p5, %p53_p4 }
   0xf   : > { %s938_s21 = scalar_select %p38_p6, %s842_s11, %s40_s17  }
  0x10   : > { %127 = sbr.rel (%p610_p8) target bundleno = 48 (0x30), region = 16 }
  0x17   : > { %s942_s22 = sand.u32 1, %s842_s11   ;;  %s637_s23 = sshll.u32 %s850_s13, 7 }
  0x18   : > { %s611_s24 = sshll.u32 %s942_s22, 4  ;;  %s144_s27 = scalar_lea.hbm %s1176_s0, %s637_s23 }
  0x19   : > { %s657_s28 = scalar_select %p924_p3, [#allocation0], [#allocation12] }
  0x1a   : > { %s135_s29 = scalar_lea.vmem [#allocation2], %s611_s24  ;;  %s856_s4 = smov 256  }
  0x1b   : > { %s157_s30 = sshll.u32 %s135_s29, 4  ;;  %s149_s3 = sld [smem:[%s657_s28]]   ;;  %s158_s30 = int_to_ptr.vmem [resolvable:$true] %s157_s30 }
  0x1c   : > { %658 = sst [smem:[#allocation9]] (%p924_p3), %s856_s4  ;;  %s857_s5 = smov 128  }
  0x1d   : > { %659 = sst [smem:[#allocation9 + $0x1]] (%p924_p3), %s857_s5  ;;  %s858_s6 = smov 2  }
  0x1e   : > { %660 = sst [smem:[#allocation9 + $0x2]] (%p924_p3), %s858_s6  ;;  %s859_s7 = smov 64  }
  0x1f   : > { %661 = sst [smem:[#allocation9 + $0x3]] (%p924_p3), %s859_s7  ;;  %s860_s9 = smov 4  }
  0x20   : > { %662 = sst [smem:[#allocation9 + $0x4]] (%p924_p3), %s859_s7  ;;  %s132_s19 = scalar_lea.sflag [#allocation3], %s942_s22 }
  0x21   : > { %s614_s8 = sshll.u32 %s149_s3, 26  ;;  %663 = sst [smem:[#allocation9 + $0x5]] (%p924_p3), %s860_s9 }
  0x22   : > { %s615_s17 = sadd.s32 134217728, %s614_s8  ;;  %s861_s25 = smov [#allocation8]  }
  0x23   : > { %664 = dma.general (%p924_p3), %s144_s27, 256, %s158_s30, %s132_s19, %s861_s25, [#allocation9], %s615_s17, 0  }
  0x24   : > { %s193_s29 = scalar_lea.hbm %s1177_s1, %s637_s23  ;;  %s184_s4 = scalar_lea.vmem [#allocation5], %s611_s24 }
  0x25   : > { %s665_s3 = scalar_select %p924_p3, [#allocation0], [#allocation13] }
  0x26   : > { %s206_s5 = sshll.u32 %s184_s4, 4  ;;  %s862_s7 = smov 256   ;;  %s207_s5 = int_to_ptr.vmem [resolvable:$true] %s206_s5 }
  0x27   : > { %s198_s6 = sld [smem:[%s665_s3]]   ;;  %s863_s27 = smov 128  }
  0x28   : > { %666 = sst [smem:[#allocation11]] (%p924_p3), %s862_s7  ;;  %s864_s30 = smov 2  }
  0x29   : > { %667 = sst [smem:[#allocation11 + $0x1]] (%p924_p3), %s863_s27  ;;  %s865_s8 = smov 64  }
  0x2a   : > { %668 = sst [smem:[#allocation11 + $0x2]] (%p924_p3), %s864_s30  ;;  %s866_s24 = smov 4  }
  0x2b   : > { %669 = sst [smem:[#allocation11 + $0x3]] (%p924_p3), %s865_s8  ;;  %s181_s17 = scalar_lea.sflag [#allocation6], %s942_s22 }
  0x2c   : > { %670 = sst [smem:[#allocation11 + $0x4]] (%p924_p3), %s865_s8  ;;  %s867_s19 = smov [#allocation10]  }
  0x2d   : > { %s619_s23 = sshll.u32 %s198_s6, 26  ;;  %671 = sst [smem:[#allocation11 + $0x5]] (%p924_p3), %s866_s24 }
  0x2e   : > { %s620_s9 = sadd.s32 134217728, %s619_s23 }
  0x2f   : > { %672 = dma.general (%p924_p3), %s193_s29, 256, %s207_s5, %s181_s17, %s867_s19, [#allocation11], %s620_s9, 0  }
  0x30 PF: > { %p621_p9 = scmp.ge.s32.totalorder %s854_s14, 1  ;;  %p227_p10 = scmp.lt.s32.totalorder %s854_s14, 3 }
  0x32   : > { %p228_p11 = pnand %p621_p9, %p227_p10 }
  0x33   : > { %s233_s25 = sand.u32 (!%p228_p11), 1, %s838_s10  }
  0x34   : > { %231 = sbr.rel (%p228_p11) target bundleno = 151 (0x97), region = 28  ;;  %s622_s26 = sshll.u32 (!%p228_p11), %s233_s25, 4 }
  0x35   : > { %s234_s28 = scalar_lea.sflag (!%p228_p11), [#allocation3], %s233_s25  ;;  %s237_s3 = scalar_lea.vmem (!%p228_p11), [#allocation2], %s622_s26 }
  0x3b   : > { %821 = dma.done.wait (%p933_p7), %s234_s28, 256  }
  0x3c   : > { %823 = vsyncadd (%p933_p7), %s234_s28, 4294967040  ;;  %s243_s18 = scalar_lea.sflag [#allocation6], %s233_s25  ;;  %s246_s22 = scalar_lea.vmem [#allocation5], %s622_s26 }
  0x3d   : > { %825 = dma.done.wait (%p933_p7), %s243_s18, 256  }
  0x3e   : > { %827 = vsyncadd (%p933_p7), %s243_s18, 4294967040  ;;  %p624_p12 = scmp.ne.s32.totalorder %s846_s12, 0 }
  0x3f   : > { %v868_v0 = vmov (!%p624_p12), 0.0  }
  0x40   : > { %274 = sbr.rel (%p624_p12) target bundleno = 71 (0x47), region = 40  ;;  %275 = vst [vmem:[#allocation7] sm:$0x3] (!%p624_p12), %v868_v0  ;;  %276 = vst [vmem:[#allocation7 + $0x2] sm:$0x3] (!%p624_p12), %v868_v0 }
  0x41   : > { %277 = vst [vmem:[#allocation7 + $0x4] sm:$0x3] (!%p624_p12), %v868_v0  ;;  %278 = vst [vmem:[#allocation7 + $0x6] sm:$0x3] (!%p624_p12), %v868_v0 }
  0x47 PF: > { %v640_v1 = vld [vmem:[%s237_s3] sm:$0xff]   ;;  %v655_v2 = vld [vmem:[%s237_s3 + $0x8] sm:$0xff]   ;;  %v869_v23 = vmov 0.0   ;;  %vm432_vm8 = vcmask 1041409   ;;  %s870_s12 = smov [#allocation7]   ;;  %p1132_p13 = scmp.eq.s32.totalorder %s608_s15, 1 }
  0x48   : > { %v648_v3 = vld [vmem:[%s246_s22] sm:$0xff]   ;;  %v998_v4 = vunpack.c.l.bf16 %v640_v1  ;;  %v1000_v5 = vunpack.c.h.bf16 %v640_v1  ;;  %v1002_v6 = vunpack.c.l.bf16 %v655_v2  ;;  %v1004_v7 = vunpack.c.h.bf16 %v655_v2  ;;  %v656_v9 = vld [vmem:[%s246_s22 + $0x8] sm:$0xff]   ;;  %s515_s20 = sshll.u32 %s870_s12, 4  ;;  %s516_s20 = int_to_ptr.vmem [resolvable:$true] %s515_s20 }
  0x49   : > { %v649_v8 = vunpack.c.l.bf16 %v648_v3  ;;  %v650_v10 = vunpack.c.h.bf16 %v648_v3  ;;  %v653_v14 = vunpack.c.l.bf16 %v656_v9  ;;  %v654_v15 = vunpack.c.h.bf16 %v656_v9  ;;  %s770_s4 = scalar_lea.vmem %s516_s20, 128  ;;  %p777_p3 = scmp.lt.s32.totalorder %s516_s20, %s516_s20 }
  0x4a   : > { %v319_v11 = vand.u32 2147483647, %v998_v4  ;;  %v320_v12 = vand.u32 2147483647, %v1000_v5  ;;  %v321_v13 = vand.u32 2147483647, %v1002_v6  ;;  %p771_p0 = scmp.ne.s32.totalorder %s516_s20, %s770_s4  ;;  %p778_p4 = scmp.lt.s32.totalorder %s770_s4, %s770_s4 }
  0x4b   : > { %vm295_vm0 = vcmp.eq.f32.partialorder %v649_v8, 0.0  ;;  %vm296_vm1 = vcmp.eq.f32.partialorder %v650_v10, 0.0  ;;  %v322_v16 = vand.u32 2147483647, %v1004_v7  ;;  %vm297_vm2 = vcmp.eq.f32.partialorder %v653_v14, 0.0 }
  0x4c   : > { %v323_v17 = vsub.f32 0.0, %v319_v11  ;;  %v324_v18 = vsub.f32 0.0, %v320_v12  ;;  %v325_v19 = vsub.f32 0.0, %v321_v13  ;;  %vm298_vm3 = vcmp.eq.f32.partialorder %v654_v15, 0.0  ;;  %p772_p1 = pnand %p771_p0, %p1132_p13  ;;  %p779_p5 = por %p778_p4, %p777_p3 }
  0x4d   : > { %v326_v20 = vsub.f32 0.0, %v322_v16  ;;  %v1010_v24 = vsel %vm295_vm0, 1.0, %v869_v23  ;;  %v1012_v25 = vsel %vm296_vm1, 1.0, %v869_v23  ;;  %v1016_v29 = vsel %vm297_vm2, 1.0, %v869_v23 }
  0x4e   : > { %v327_v21 = vmul.f32 1.442695, %v323_v17  ;;  %v329_v22 = vmul.f32 1.442695, %v324_v18  ;;  %v331_v26 = vmul.f32 1.442695, %v325_v19  ;;  %v439_v28 = vadd.f32 %v1012_v25, %v1010_v24  ;;  %p773_p2 = pneg %p772_p1 }
  0x4f   : > { %v333_v27 = vmul.f32 1.442695, %v326_v20  ;;  %v1018_v30 = vsel %vm298_vm3, 1.0, %v869_v23  ;;  %vm307_vm4 = vcmp.eq.f32.partialorder %v649_v8, 1.0  ;;  %vm308_vm5 = vcmp.eq.f32.partialorder %v650_v10, 1.0 }
  0x50   : > { %746 = vpow2.f32 %v327_v21  ;;  %v440_v31 = vrot.slane %v439_v28, 4  ;;  %v446_v32 = vadd.f32 %v1018_v30, %v1016_v29  ;;  %v1022_v37 = vsel %vm307_vm4, 1.0, %v869_v23  ;;  %v438_v19 = vld [vmem:[#allocation7 + $0x2] sm:$0x3]  ;;  %p780_p6 = pnand %p779_p5, %p773_p2 }
  0x51   : > { %748 = vpow2.f32 %v329_v22  ;;  %v1024_v38 = vsel %vm308_vm5, 1.0, %v869_v23  ;;  %vm309_vm6 = vcmp.eq.f32.partialorder %v653_v14, 1.0  ;;  %vm310_vm7 = vcmp.eq.f32.partialorder %v654_v15, 1.0 }
  0x52   : > { %750 = vpow2.f32 %v331_v26  ;;  %v441_v33 = vadd.f32 %v440_v31, %v439_v28  ;;  %v447_v34 = vrot.slane %v446_v32, 4  ;;  %v487_v39 = vadd.f32 %v1024_v38, %v1022_v37 }
  0x53   : > { %752 = vpow2.f32 %v333_v27  ;;  %v359_v40 = vmax.f32 %v998_v4, 0.0  ;;  %v360_v41 = vmax.f32 %v1000_v5, 0.0  ;;  %v363_v42 = vmul.f32 %v649_v8, %v998_v4 }
  0x54   : > { %v442_v35 = vrot.slane %v441_v33, 2  ;;  %v448_v36 = vadd.f32 %v447_v34, %v446_v32  ;;  %v364_v43 = vmul.f32 %v650_v10, %v1000_v5  ;;  %v361_v44 = vmax.f32 %v1002_v6, 0.0 }
  0x55   : > { %v365_v48 = vmul.f32 %v653_v14, %v1002_v6  ;;  %v1036_v49 = vsel %vm309_vm6, 1.0, %v869_v23  ;;  %v1038_v50 = vsel %vm310_vm7, 1.0, %v869_v23  ;;  %v488_v51 = vrot.slane %v487_v39, 4 }
  0x56   : > { %v443_v45 = vadd.f32 %v442_v35, %v441_v33  ;;  %v449_v46 = vrot.slane %v448_v36, 2  ;;  %v362_v54 = vmax.f32 %v1004_v7, 0.0  ;;  %v366_v55 = vmul.f32 %v654_v15, %v1004_v7 }
  0x57   : > { %v494_v56 = vadd.f32 %v1038_v50, %v1036_v49  ;;  %v1050_v59 = vsub.f32 %v359_v40, %v363_v42  ;;  %v1052_v60 = vsub.f32 %v360_v41, %v364_v43  ;;  %v1058_v2 = vsub.f32 %v361_v44, %v365_v48 }
  0x58   : > { %v444_v63 = vrot.slane %v443_v45, 1  ;;  %v450_v0 = vadd.f32 %v449_v46, %v448_v36  ;;  %v489_v3 = vadd.f32 %v488_v51, %v487_v39  ;;  %v1060_v8 = vsub.f32 %v362_v54, %v366_v55 }
  0x59   : > { %v495_v10 = vrot.slane %v494_v56, 4  ;;  %vm347_vm9 = vcmp.ge.f32.partialorder %v998_v4, 0.0  ;;  %vm348_vm10 = vcmp.ge.f32.partialorder %v1000_v5, 0.0  ;;  %vm349_vm11 = vcmp.ge.f32.partialorder %v1002_v6, 0.0  ;;  %v486_v4 = vld [vmem:[#allocation7 + $0x6] sm:$0x3] }
  0x5a   : > { %v1033_v47 = vpop.eup %746  ;;  %v445_v13 = vadd.f32 %v444_v63, %v443_v45  ;;  %v451_v14 = vrot.slane %v450_v0, 1  ;;  %v490_v17 = vrot.slane %v489_v3, 2  ;;  %vm350_vm14 = vcmp.ge.f32.partialorder %v1004_v7, 0.0 }
  0x5b   : > { %v1040_v52 = vpop.eup %748  ;;  %v335_v53 = vadd.f32 1.0, %v1033_v47  ;;  %v374_v9 = vmul.f32 -0.5, %v1033_v47  ;;  %v377_v12 = vand.u32 2147483647, %v1033_v47  ;;  %v496_v21 = vadd.f32 %v495_v10, %v494_v56 }
  0x5c   : > { %v1047_v57 = vpop.eup %750  ;;  %v336_v58 = vadd.f32 1.0, %v1040_v52  ;;  %v383_v11 = vmul.f32 -0.5, %v1040_v52  ;;  %v386_v15 = vand.u32 2147483647, %v1040_v52  ;;  %v452_v20 = vadd.f32 %v451_v14, %v450_v0 }
  0x5d   : > { %v1054_v61 = vpop.eup %752  ;;  %v337_v62 = vadd.f32 1.0, %v1047_v57  ;;  %754 = vrcp.f32 %v335_v53  ;;  %v392_v16 = vmul.f32 -0.5, %v1047_v57  ;;  %v375_v18 = vadd.f32 1.0, %v374_v9 }
  0x5e   : > { %v338_v1 = vadd.f32 1.0, %v1054_v61  ;;  %756 = vrcp.f32 %v336_v58  ;;  %v384_v22 = vadd.f32 1.0, %v383_v11  ;;  %v401_v23 = vmul.f32 -0.5, %v1054_v61 }
  0x5f   : > { %758 = vrcp.f32 %v337_v62  ;;  %v491_v26 = vadd.f32 %v490_v17, %v489_v3  ;;  %v395_v27 = vand.u32 2147483647, %v1047_v57  ;;  %v455_v28 = vsel %vm432_vm8, %v452_v20, %v445_v13 }
  0x60   : > { %760 = vrcp.f32 %v338_v1  ;;  %v497_v31 = vrot.slane %v496_v21, 2  ;;  %v393_v32 = vadd.f32 1.0, %v392_v16  ;;  %v404_v33 = vand.u32 2147483647, %v1054_v61 }
  0x61   : > { %762 = vlog2.f32 %v335_v53  ;;  %v457_v34 = vadd.f32 %v455_v28, %v438_v19  ;;  %v492_v35 = vrot.slane %v491_v26, 1  ;;  %vm1074_vm12 = vcmp.lt.f32.partialorder %v377_v12, 0.0004427343 }
  0x62   : > { %764 = vlog2.f32 %v336_v58  ;;  %vm1078_vm13 = vcmp.lt.f32.partialorder %v386_v15, 0.0004427343  ;;  %v498_v41 = vadd.f32 %v497_v31, %v496_v21  ;;  %v376_v43 = vmul.f32 %v1033_v47, %v375_v18 }
  0x63   : > { %766 = vlog2.f32 %v337_v62  ;;  %v385_v44 = vmul.f32 %v1040_v52, %v384_v22  ;;  %v402_v45 = vadd.f32 1.0, %v401_v23  ;;  %458 = vst [vmem:[#allocation7 + $0x2] sm:$0x3] %v457_v34  ;;  %vm1086_vm15 = vcmp.lt.f32.partialorder %v395_v27, 0.0004427343 }
  0x64   : > { %768 = vlog2.f32 %v338_v1  ;;  %v493_v54 = vadd.f32 %v492_v35, %v491_v26  ;;  %v499_v55 = vrot.slane %v498_v41, 1  ;;  %v394_v58 = vmul.f32 %v1047_v57, %v393_v32 }
  0x65   : > { %vm1092_vm0 = vcmp.lt.f32.partialorder %v404_v33, 0.0004427343  ;;  %v403_v12 = vmul.f32 %v1054_v61, %v402_v45 }
  0x66   : > { %v500_v9 = vadd.f32 %v499_v55, %v498_v41 }
  0x67   : > { %v755_v36 = vpop.eup %754 }
  0x68   : > { %v757_v42 = vpop.eup %756  ;;  %v351_v46 = vmul.f32 %v755_v36, %v1033_v47 }
  0x69   : > { %v759_v48 = vpop.eup %758  ;;  %v352_v53 = vmul.f32 %v757_v42, %v1040_v52 }
  0x6a   : > { %v761_v56 = vpop.eup %760  ;;  %v353_v63 = vmul.f32 %v759_v48, %v1047_v57  ;;  %v355_v47 = vsel %vm347_vm9, %v755_v36, %v351_v46 }
  0x6b   : > { %v763_v0 = vpop.eup %762  ;;  %v354_v1 = vmul.f32 %v761_v56, %v1054_v61  ;;  %v356_v52 = vsel %vm348_vm10, %v757_v42, %v352_v53  ;;  %v461_v3 = vmul.f32 %v1022_v37, %v355_v47  ;;  %v503_v37 = vsel %vm432_vm8, %v500_v9, %v493_v54  ;;  %v460_v53 = vld [vmem:[#allocation7 + $0x4] sm:$0x3]  ;;  %v411_v47 = vld [vmem:[#allocation7] sm:$0x3] }
  0x6c   : > { %v765_v10 = vpop.eup %764  ;;  %v373_v11 = vmul.f32 0.6931472, %v763_v0  ;;  %v357_v13 = vsel %vm349_vm11, %v759_v48, %v353_v63  ;;  %v462_v57 = vmul.f32 %v1024_v38, %v356_v52  ;;  %v505_v7 = vadd.f32 %v503_v37, %v486_v4 }
  0x6d   : > { %v767_v14 = vpop.eup %766  ;;  %v382_v15 = vmul.f32 0.6931472, %v765_v10  ;;  %v358_v16 = vsel %vm350_vm14, %v761_v56, %v354_v1  ;;  %v463_v5 = vmul.f32 %v1036_v49, %v357_v13 }
  0x6e   : > { %v769_v17 = vpop.eup %768  ;;  %v379_v18 = vsel %vm1074_vm12, %v376_v43, %v373_v11  ;;  %v391_v61 = vmul.f32 0.6931472, %v767_v14  ;;  %v464_v6 = vmul.f32 %v1038_v50, %v358_v16  ;;  %v465_v19 = vadd.f32 %v462_v57, %v461_v3  ;;  %506 = vst [vmem:[#allocation7 + $0x6] sm:$0x3] %v505_v7 }
  0x6f   : > { %v388_v38 = vsel %vm1078_vm13, %v385_v44, %v382_v15  ;;  %v400_v20 = vmul.f32 0.6931472, %v769_v17  ;;  %v407_v21 = vadd.f32 %v379_v18, %v1050_v59 }
  0x70   : > { %v397_v49 = vsel %vm1086_vm15, %v394_v58, %v391_v61  ;;  %v408_v22 = vadd.f32 %v388_v38, %v1052_v60  ;;  %v466_v23 = vrot.slane %v465_v19, 4  ;;  %v472_v26 = vadd.f32 %v464_v6, %v463_v5 }
  0x71   : > { %v406_v27 = vsel %vm1092_vm0, %v403_v12, %v400_v20  ;;  %v409_v50 = vadd.f32 %v397_v49, %v1058_v2  ;;  %v412_v28 = vmul.f32 %v1010_v24, %v407_v21 }
  0x72   : > { %v410_v31 = vadd.f32 %v406_v27, %v1060_v8  ;;  %v413_v59 = vmul.f32 %v1012_v25, %v408_v22  ;;  %v467_v32 = vadd.f32 %v466_v23, %v465_v19  ;;  %v473_v33 = vrot.slane %v472_v26, 4 }
  0x73   : > { %v414_v34 = vmul.f32 %v1016_v29, %v409_v50 }
  0x74   : > { %v415_v60 = vmul.f32 %v1018_v30, %v410_v31  ;;  %v416_v35 = vadd.f32 %v413_v59, %v412_v28  ;;  %v468_v36 = vrot.slane %v467_v32, 2  ;;  %v474_v39 = vadd.f32 %v473_v33, %v472_v26 }
  0x76   : > { %v417_v40 = vrot.slane %v416_v35, 4  ;;  %v423_v41 = vadd.f32 %v415_v60, %v414_v34  ;;  %v469_v42 = vadd.f32 %v468_v36, %v467_v32  ;;  %v475_v2 = vrot.slane %v474_v39, 2 }
  0x78   : > { %v418_v43 = vadd.f32 %v417_v40, %v416_v35  ;;  %v424_v24 = vrot.slane %v423_v41, 4  ;;  %v470_v44 = vrot.slane %v469_v42, 1  ;;  %v476_v45 = vadd.f32 %v475_v2, %v474_v39 }
  0x7a   : > { %v419_v8 = vrot.slane %v418_v43, 2  ;;  %v425_v46 = vadd.f32 %v424_v24, %v423_v41  ;;  %v471_v25 = vadd.f32 %v470_v44, %v469_v42  ;;  %v477_v48 = vrot.slane %v476_v45, 1 }
  0x7c   : > { %v420_v51 = vadd.f32 %v419_v8, %v418_v43  ;;  %v426_v29 = vrot.slane %v425_v46, 2  ;;  %v478_v30 = vadd.f32 %v477_v48, %v476_v45 }
  0x7e   : > { %v421_v54 = vrot.slane %v420_v51, 1  ;;  %v427_v55 = vadd.f32 %v426_v29, %v425_v46  ;;  %v481_v56 = vsel %vm432_vm8, %v478_v30, %v471_v25 }
  0x7f   : > { %v483_v58 = vadd.f32 %v481_v56, %v460_v53 }
  0x80   : > { %v422_v62 = vadd.f32 %v421_v54, %v420_v51  ;;  %v428_v63 = vrot.slane %v427_v55, 1 }
  0x81   : > { %484 = vst [vmem:[#allocation7 + $0x4] sm:$0x3] %v483_v58 }
  0x82   : > { %v429_v0 = vadd.f32 %v428_v63, %v427_v55 }
  0x84   : > { %v433_v1 = vsel %vm432_vm8, %v429_v0, %v422_v62 }
  0x85   : > { %v435_v52 = vadd.f32 %v433_v1, %v411_v47 }
  0x87   : > { %436 = vst [vmem:[#allocation7] sm:$0x3] %v435_v52 }
  0x88   : > { %783 = shalt.err (!%p780_p6)
}
  0x89   : > { %s784_s15 = scalar_lea.hbm %s1178_s2, 128 }
  0x8a   : > { %p785_p7 = scmp.ne.s32.totalorder %s1178_s2, %s784_s15  ;;  %p790_p10 = scmp.lt.u32.totalorder %s784_s15, %s1178_s2 }
  0x8c   : > { %p786_p8 = pnand %p785_p7, %p1132_p13 }
  0x8e   : > { %p787_p9 = pneg %p786_p8 }
  0x90   : > { %p792_p11 = pnand %p790_p10, %p787_p9 }
  0x92   : > { %795 = shalt.err (!%p792_p11)
}
  0x93   : > { %s871_s23 = smov 32   ;;  %s872_s24 = smov 2  }
  0x94   : > { %676 = dma.vmem_to_hbm [thread:$0]  (%p1132_p13), %s516_s20, 128, %s1178_s2, [#allocation4], %s871_s23, %s871_s23, %s872_s24  }
  0x95   : > { %829 = dma.done.wait (%p1132_p13), [#allocation4], 128  }
  0x96   : > { %831 = vsyncadd (%p1132_p13), [#allocation4], 4294967168 }
  0x97 PF: > { %s19_s14 = sadd.s32 1, %s854_s14   ;;  %s1190_s9 = smov %s838_s10 }
  0x98   : > { %p16_p12 = scmp.ge.s32.totalorder %s19_s14, 4   ;;  %s1191_s10 = smov %s842_s11 }
  0x99   : > { %s1192_s11 = smov %s938_s21  ;;  %s1193_s12 = smov %s850_s13 }
  0x9a   : > { %s1194_s13 = smov %s1196_s16  ;;  %18 = sbr.rel (!%p16_p12) target bundleno = 7 (0x7), region = 96 }
  0xa1   :  { %531 = vsyncpa [#allocation3], 1 }
  0xa2   :  { %533 = vsyncpa [#allocation3 + $0x1], 1 }
  0xa3   :  { %534 = vsyncpa [#allocation6], 1 }
  0xa4   :  { %536 = vsyncpa [#allocation6 + $0x1], 1 }
  0xa5   :  { %537 = vsyncpa [#allocation4], 1 }
  0xa6   :  { %539 = vsyncpa [#allocation4 + $0x1], 1 }

</bundles_post_ra>
